<compile_context>
chip_gen: v7x
topology: tpu7x:2x2x1
jax: 0.10.0
libtpu: 0.0.40
codegen_flags: <defaults>
</compile_context>

<pallas_src>
import functools
import math

import jax
import jax.numpy as jnp
from jax.experimental import pallas as pl
from jax.experimental.pallas import tpu as pltpu


def _round_up(x, m):
    return ((x + m - 1) // m) * m


def _conv_mtl_kernel(p_ref, w_ref, b_ref, o_ref, acc_ref):
    """One (tm, tn) output tile, accumulated over the K grid axis.

    p_ref: (tm, tk)  im2col patches tile
    w_ref: (tk, tn)  pre-fused (weight * mtl_weight) tile
    b_ref: (1,  tn)  pre-fused (bias + mtl_bias) tile
    o_ref: (tm, tn)  output tile (written on the last K step)
    acc_ref: (tm, tn) f32 accumulator scratch
    """
    k = pl.program_id(3)

    @pl.when(k == 0)
    def _():
        acc_ref[...] = jnp.zeros_like(acc_ref)

    acc_ref[...] += jnp.dot(p_ref[...], w_ref[...],
                            preferred_element_type=jnp.float32)

    @pl.when(k == pl.num_programs(3) - 1)
    def _():
        o_ref[...] = (acc_ref[...] + b_ref[...].astype(jnp.float32)
                      ).astype(o_ref.dtype)


@functools.partial(
    jax.jit,
    static_argnames=("stride", "padding", "dilation", "groups", "MTL",
                     "use_bf16", "tm_max", "tn_max", "tk_max"))
def conv2d_mtl(x, weight, mtl_weight, bias, mtl_bias, *,
               stride=(1, 1), padding=(0, 0), dilation=(1, 1),
               groups=1, MTL=True, use_bf16=False,
               tm_max=512, tn_max=256, tk_max=1024):
    """Functional equivalent of Conv2dMtl.forward (NCHW in, NCHW out).

    x:          (N, C, H, W)
    weight:     (O, C//groups, KH, KW)
    mtl_weight: (O, C//groups, 1, 1)
    bias:       (O,) or None
    mtl_bias:   (O,) or None
    """
    N, C, H, W = x.shape
    O, Cg, KH, KW = weight.shape
    sh, sw = stride
    ph, pw = padding
    dh, dw = dilation
    OH = (H + 2 * ph - dh * (KH - 1) - 1) // sh + 1
    OW = (W + 2 * pw - dw * (KW - 1) - 1) // sw + 1
    Og = O // groups

    # ---- MTL parameter fusion (done once; tiny vs. the conv itself) -------
    if MTL:
        new_w = weight * jnp.broadcast_to(mtl_weight, weight.shape)
        if bias is not None:
            new_b = bias + (mtl_bias if mtl_bias is not None else 0.0)
        else:
            new_b = None
    else:
        new_w = weight
        new_b = bias
    if new_b is None:
        new_b = jnp.zeros((O,), x.dtype)

    # ---- im2col (wrapper glue) ---------------------------------------------
    xp = jnp.pad(x, ((0, 0), (0, 0), (ph, ph), (pw, pw)))
    cols = []
    for kh in range(KH):
        for kw in range(KW):
            h0, w0 = kh * dh, kw * dw
            cols.append(xp[:, :, h0:h0 + (OH - 1) * sh + 1:sh,
                                 w0:w0 + (OW - 1) * sw + 1:sw])   # (N,C,OH,OW)
    patches = jnp.stack(cols, axis=2)                  # (N, C, KH*KW, OH, OW)
    patches = patches.transpose(0, 3, 4, 1, 2)         # (N, OH, OW, C, KH*KW)
    patches = patches.reshape(N, OH, OW, groups, Cg * KH * KW)
    patches = patches.transpose(3, 0, 1, 2, 4)
    patches = patches.reshape(groups, N * OH * OW, Cg * KH * KW)

    M = N * OH * OW
    Kdim = Cg * KH * KW

    # ---- tile sizes: largest 128-multiple tiles dividing the padded dims --
    if Kdim % 128 == 0:
        tk = 128
        for cand in range(min(tk_max, Kdim), 127, -128):
            if Kdim % cand == 0:
                tk = cand
                break
        Kp = Kdim
    else:
        tk = min(tk_max, _round_up(Kdim, 128))
        Kp = _round_up(Kdim, tk)

    Op = _round_up(Og, 128)
    tn = 128
    for cand in range(min(tn_max, Op), 127, -128):
        if Op % cand == 0:
            tn = cand
            break

    tm = min(tm_max, _round_up(M, 8))
    nM = pl.cdiv(M, tm)          # last M block may be partial (stores masked)

    # ---- zero-pad K (required for matmul correctness) and Oc --------------
    if Kp != Kdim:
        patches = jnp.pad(patches, ((0, 0), (0, 0), (0, Kp - Kdim)))
    w2 = new_w.reshape(groups, Og, Kdim).transpose(0, 2, 1)     # (g, Kdim, Og)
    if Kp != Kdim or Op != Og:
        w2 = jnp.pad(w2, ((0, 0), (0, Kp - Kdim), (0, Op - Og)))
    b2 = new_b.astype(x.dtype).reshape(groups, 1, Og)
    if Op != Og:
        b2 = jnp.pad(b2, ((0, 0), (0, 0), (0, Op - Og)))

    in_dtype = jnp.bfloat16 if use_bf16 else x.dtype
    patches = patches.astype(in_dtype)
    w2 = w2.astype(in_dtype)

    # ---- VMEM budget & cost estimate ---------------------------------------
    in_bytes = jnp.dtype(in_dtype).itemsize
    out_bytes = jnp.dtype(x.dtype).itemsize
    est_vmem = (2 * tm * tk * in_bytes          # patches, double-buffered
                + 2 * tk * tn * in_bytes        # weight,  double-buffered
                + 2 * 8 * tn * 4                # bias
                + tm * tn * 4                   # f32 accumulator scratch
                + 2 * tm * tn * out_bytes)      # output,  double-buffered
    vmem_limit = int(min(max(2 * est_vmem, 32 * 1024 * 1024), 64 * 1024 * 1024))

    cost = pl.CostEstimate(
        flops=int(2 * groups * M * Kdim * Og),
        transcendentals=0,
        bytes_accessed=int(patches.size * in_bytes + w2.size * in_bytes
                           + b2.size * out_bytes + groups * M * Op * out_bytes))

    grid = (groups, nM, Op // tn, Kp // tk)

    out = pl.pallas_call(
        _conv_mtl_kernel,
        out_shape=jax.ShapeDtypeStruct((groups, M, Op), x.dtype),
        grid_spec=pltpu.PrefetchScalarGridSpec(
            num_scalar_prefetch=0,
            grid=grid,
            in_specs=[
                pl.BlockSpec((None, tm, tk), lambda g, i, j, k: (g, i, k)),
                pl.BlockSpec((None, tk, tn), lambda g, i, j, k: (g, k, j)),
                pl.BlockSpec((None, 1, tn),  lambda g, i, j, k: (g, 0, j)),
            ],
            out_specs=pl.BlockSpec((None, tm, tn), lambda g, i, j, k: (g, i, j)),
            scratch_shapes=[pltpu.VMEM((tm, tn), jnp.float32)],
        ),
        compiler_params=pltpu.CompilerParams(
            dimension_semantics=("parallel", "parallel", "parallel", "arbitrary"),
            vmem_limit_bytes=vmem_limit),
        cost_estimate=cost,
    )(patches, w2, b2)

    if Op != Og:
        out = out[:, :, :Og]
    y = out.reshape(groups, N, OH, OW, Og).transpose(1, 0, 4, 2, 3)
    return y.reshape(N, O, OH, OW)


def _reference(x, weight, mtl_weight, bias, mtl_bias, stride, padding,
               dilation, groups, MTL):
    """Pure-JAX reference of the PyTorch Conv2dMtl.forward semantics."""
    if MTL:
        w = weight * jnp.broadcast_to(mtl_weight, weight.shape)
        b = None if bias is None else bias + mtl_bias
    else:
        w, b = weight, bias
    y = jax.lax.conv_general_dilated(
        x, w, window_strides=stride,
        padding=((padding[0], padding[0]), (padding[1], padding[1])),
        rhs_dilation=dilation, feature_group_count=groups,
        dimension_numbers=("NCHW", "OIHW", "NCHW"))
    if b is not None:
        y = y + b[None, :, None, None]
    return y


if __name__ == "__main__":
    key = jax.random.PRNGKey(0)

    # Case 1 — Conv2dMtl(4, 8, 3, stride=1, padding=1, bias=True, MTL=True)
    N, C_in, H, W = 2, 4, 16, 16
    C_out, K = 8, 3
    stride, padding, dilation, groups = (1, 1), (1, 1), (1, 1), 1

    k1, k2, k3, k4, k5, key = jax.random.split(key, 6)
    n = C_in * K * K
    stdv = 1.0 / math.sqrt(n)
    weight = jax.random.uniform(k1, (C_out, C_in, K, K), jnp.float32, -stdv, stdv)
    mtl_weight = jax.random.uniform(k2, (C_out, C_in, 1, 1), jnp.float32, 0.5, 1.5)
    bias = jax.random.uniform(k3, (C_out,), jnp.float32, -stdv, stdv)
    mtl_bias = jax.random.uniform(k4, (C_out,), jnp.float32, -0.1, 0.1)
    x = jax.random.normal(k5, (N, C_in, H, W), jnp.float32)

    y = conv2d_mtl(x, weight, mtl_weight, bias, mtl_bias,
                   stride=stride, padding=padding, dilation=dilation,
                   groups=groups, MTL=True)
    jax.block_until_ready(y)
    ref = _reference(x, weight, mtl_weight, bias, mtl_bias,
                     stride, padding, dilation, groups, True)
    assert y.shape == ref.shape == (N, C_out, H, W)
    assert jnp.allclose(y, ref, atol=1e-4, rtol=1e-4), "case 1 mismatch"

    # Case 2 — groups=2, stride=2 (exercises group grid axis + partial M block)
    N2, C2_in, H2, W2 = 2, 8, 10, 10
    C2_out, K2 = 16, 3
    stride2, padding2, dilation2, groups2 = (2, 2), (1, 1), (1, 1), 2

    k1, k2, k3, k4, k5, key = jax.random.split(key, 6)
    n2 = C2_in * K2 * K2
    stdv2 = 1.0 / math.sqrt(n2)
    weight2 = jax.random.uniform(k1, (C2_out, C2_in // groups2, K2, K2),
                                 jnp.float32, -stdv2, stdv2)
    mtl_weight2 = jax.random.uniform(k2, (C2_out, C2_in // groups2, 1, 1),
                                     jnp.float32, 0.5, 1.5)
    bias2 = jax.random.uniform(k3, (C2_out,), jnp.float32, -stdv2, stdv2)
    mtl_bias2 = jax.random.uniform(k4, (C2_out,), jnp.float32, -0.1, 0.1)
    x2 = jax.random.normal(k5, (N2, C2_in, H2, W2), jnp.float32)

    y2 = conv2d_mtl(x2, weight2, mtl_weight2, bias2, mtl_bias2,
                    stride=stride2, padding=padding2, dilation=dilation2,
                    groups=groups2, MTL=True)
    jax.block_until_ready(y2)
    ref2 = _reference(x2, weight2, mtl_weight2, bias2, mtl_bias2,
                      stride2, padding2, dilation2, groups2, True)
    assert y2.shape == ref2.shape
    assert jnp.allclose(y2, ref2, atol=1e-4, rtol=1e-4), "case 2 mismatch"

    print("KERNEL_OK")
</pallas_src>

<mosaic_0001>
module attributes {stable_mosaic.version = 11 : i64} {
  func.func @_conv_mtl_kernel(%arg0: i32, %arg1: i32, %arg2: i32, %arg3: i32, %arg4: memref<1x512x128xf32, #tpu.memory_space<vmem>>, %arg5: memref<1x128x128xf32, #tpu.memory_space<vmem>>, %arg6: memref<1x1x128xf32, #tpu.memory_space<vmem>>, %arg7: memref<1x512x128xf32, #tpu.memory_space<vmem>>, %arg8: memref<512x128xf32, #tpu.memory_space<vmem>>) attributes {dimension_semantics = [#tpu.dimension_semantics<parallel>, #tpu.dimension_semantics<parallel>, #tpu.dimension_semantics<parallel>, #tpu.dimension_semantics<arbitrary>], iteration_bounds = array<i64: 1, 1, 1, 1>, scalar_prefetch = 0 : i64, scratch_operands = 1 : i64, tpu.core_type = #tpu.core_type<tc>, window_params = [{transform_indices = @transform_0, window_bounds = array<i64: 1, 512, 128>}, {transform_indices = @transform_1, window_bounds = array<i64: 1, 128, 128>}, {transform_indices = @transform_2, window_bounds = array<i64: 1, 1, 128>}, {transform_indices = @transform_3, window_bounds = array<i64: 1, 512, 128>}]} {
    %c0_i32 = arith.constant 0 : i32
    %0 = arith.cmpi eq, %arg3, %c0_i32 : i32
    %1 = arith.extui %0 : i1 to i32
    %c0_i32_0 = arith.constant 0 : i32
    %2 = arith.cmpi ne, %1, %c0_i32_0 : i32
    scf.if %2 {
      %cst_12 = arith.constant 0.000000e+00 : f32
      %14 = vector.broadcast %cst_12 : f32 to vector<512x128xf32>
      %c0_13 = arith.constant 0 : index
      %c0_14 = arith.constant 0 : index
      %15 = vector.load %arg8[%c0_13, %c0_14] : memref<512x128xf32, #tpu.memory_space<vmem>>, vector<512x128xf32>
      tpu.vector_store %arg8[%c0_13, %c0_14], %14 {strides = array<i32>} : memref<512x128xf32, #tpu.memory_space<vmem>>, vector<512x128xf32>,
    } else {
    }
    %c0 = arith.constant 0 : index
    %c0_1 = arith.constant 0 : index
    %3 = vector.load %arg8[%c0, %c0_1] : memref<512x128xf32, #tpu.memory_space<vmem>>, vector<512x128xf32>
    %c0_2 = arith.constant 0 : index
    %c0_3 = arith.constant 0 : index
    %c0_4 = arith.constant 0 : index
    %4 = vector.load %arg4[%c0_2, %c0_3, %c0_4] : memref<1x512x128xf32, #tpu.memory_space<vmem>>, vector<1x512x128xf32>
    %5 = vector.shape_cast %4 : vector<1x512x128xf32> to vector<512x128xf32>
    %c0_5 = arith.constant 0 : index
    %c0_6 = arith.constant 0 : index
    %c0_7 = arith.constant 0 : index
    %6 = vector.load %arg5[%c0_5, %c0_6, %c0_7] : memref<1x128x128xf32, #tpu.memory_space<vmem>>, vector<1x128x128xf32>
    %7 = vector.shape_cast %6 : vector<1x128x128xf32> to vector<128x128xf32>
    %cst = arith.constant dense<0.000000e+00> : vector<512x128xf32>
    %8 = tpu.matmul %5, %7, %cst {dimension_numbers = #tpu.dot_dimension_numbers<[1], [0], [0], [1], [0, 0, 1, 1], [], []>} : vector<512x128xf32>, vector<128x128xf32>, vector<512x128xf32> -> vector<512x128xf32>
    %9 = arith.addf %3, %8 : vector<512x128xf32>
    %c0_8 = arith.constant 0 : index
    %c0_9 = arith.constant 0 : index
    %10 = vector.load %arg8[%c0_8, %c0_9] : memref<512x128xf32, #tpu.memory_space<vmem>>, vector<512x128xf32>
    tpu.vector_store %arg8[%c0_8, %c0_9], %9 {strides = array<i32>} : memref<512x128xf32, #tpu.memory_space<vmem>>, vector<512x128xf32>,
    %c0_i32_10 = arith.constant 0 : i32
    %11 = arith.cmpi eq, %arg3, %c0_i32_10 : i32
    %12 = arith.extui %11 : i1 to i32
    %c0_i32_11 = arith.constant 0 : i32
    %13 = arith.cmpi ne, %12, %c0_i32_11 : i32
    scf.if %13 {
      %c0_12 = arith.constant 0 : index
      %c0_13 = arith.constant 0 : index
      %14 = vector.load %arg8[%c0_12, %c0_13] : memref<512x128xf32, #tpu.memory_space<vmem>>, vector<512x128xf32>
      %c0_14 = arith.constant 0 : index
      %c0_15 = arith.constant 0 : index
      %c0_16 = arith.constant 0 : index
      %15 = vector.load %arg6[%c0_14, %c0_15, %c0_16] : memref<1x1x128xf32, #tpu.memory_space<vmem>>, vector<1x1x128xf32>
      %16 = vector.shape_cast %15 : vector<1x1x128xf32> to vector<1x128xf32>
      %17 = vector.broadcast %16 : vector<1x128xf32> to vector<512x128xf32>
      %18 = arith.addf %14, %17 : vector<512x128xf32>
      %c0_17 = arith.constant 0 : index
      %c0_18 = arith.constant 0 : index
      %c0_19 = arith.constant 0 : index
      %19 = vector.load %arg7[%c0_17, %c0_18, %c0_19] : memref<1x512x128xf32, #tpu.memory_space<vmem>>, vector<1x512x128xf32>
      %20 = vector.shape_cast %19 : vector<1x512x128xf32> to vector<512x128xf32>
      %21 = vector.shape_cast %18 : vector<512x128xf32> to vector<1x512x128xf32>
      tpu.vector_store %arg7[%c0_17, %c0_18, %c0_19], %21 {strides = array<i32>} : memref<1x512x128xf32, #tpu.memory_space<vmem>>, vector<1x512x128xf32>,
    } else {
    }
    return
  }
  func.func @transform_0(%arg0: i32, %arg1: i32, %arg2: i32, %arg3: i32) -> (i32, i32, i32) {
    %c0_i32 = arith.constant 0 : i32
    return %arg0, %arg1, %arg3 : i32, i32, i32
  }
  func.func @transform_1(%arg0: i32, %arg1: i32, %arg2: i32, %arg3: i32) -> (i32, i32, i32) {
    %c0_i32 = arith.constant 0 : i32
    return %arg0, %arg3, %arg2 : i32, i32, i32
  }
  func.func @transform_2(%arg0: i32, %arg1: i32, %arg2: i32, %arg3: i32) -> (i32, i32, i32) {
    %c0_i32 = arith.constant 0 : i32
    %c0_i32_0 = arith.constant 0 : i32
    return %arg0, %c0_i32, %arg2 : i32, i32, i32
  }
  func.func @transform_3(%arg0: i32, %arg1: i32, %arg2: i32, %arg3: i32) -> (i32, i32, i32) {
    %c0_i32 = arith.constant 0 : i32
    return %arg0, %arg1, %arg2 : i32, i32, i32
  }
}

</mosaic_0001>

<bundles_post_ra>
// kernel: conv2d_mtl.1
= control target key start
LH: loop header
LB: loop body
LE: loop exit
PB: predicated region body
PF: predicated region fallthrough
CT: control target
= control target key end

     0   :  { %s1723_s1 = inlined_call_operand.vmem [shape: f32[1,128,128], index: 1, kind: input, shape index: {}]   ;;  %s1724_s0 = inlined_call_operand.vmem [shape: f32[1,512,128], index: 0, kind: input, shape index: {}]   ;;  %s1725_s2 = inlined_call_operand.vmem [shape: f32[1,1,128], index: 2, kind: input, shape index: {}]   ;;  %s1726_s3 = inlined_call_operand.vmem [shape: f32[1,512,128], index: 3, kind: output, shape index: {}]  }
   0x1   :  { %v210_v0 = vld [vmem:[%s1723_s1] sm:$0xff]  ;;  %v211_v1 = vld [vmem:[%s1723_s1 + $0x8] sm:$0xff]  ;;  %v212_v2 = vld [vmem:[%s1723_s1 + $0x10] sm:$0xff] }
   0x2   :  { %v1154_v3 = vpack.c.bf16 %v211_v1, %v210_v0  ;;  %v213_v4 = vld [vmem:[%s1723_s1 + $0x18] sm:$0xff]  ;;  %v214_v6 = vld [vmem:[%s1723_s1 + $0x20] sm:$0xff]  ;;  %v215_v7 = vld [vmem:[%s1723_s1 + $0x28] sm:$0xff] }
   0x3   :  { %v1158_v5 = vpack.c.bf16 %v213_v4, %v212_v2  ;;  %v1162_v8 = vpack.c.bf16 %v215_v7, %v214_v6  ;;  %v146_v9 = vld [vmem:[%s1724_s0] sm:$0xff]  ;;  %v216_v11 = vld [vmem:[%s1723_s1 + $0x30] sm:$0xff]  ;;  %v217_v12 = vld [vmem:[%s1723_s1 + $0x38] sm:$0xff] }
   0x4   :  { %1155 = vmatprep.subr.bf16.mxu0 %v1154_v3  ;;  %1186 = vmatprep.subr.bf16.mxu1 %v1154_v3  ;;  %v178_v10 = vld [vmem:[%s1724_s0 + $0x100] sm:$0xff]  ;;  %v1166_v13 = vpack.c.bf16 %v217_v12, %v216_v11  ;;  %v219_v15 = vld [vmem:[%s1723_s1 + $0x48] sm:$0xff]  ;;  %v220_v17 = vld [vmem:[%s1723_s1 + $0x50] sm:$0xff] }
   0x5   :  { %1157 = vmatpush3.bf16.msra.mxu0 %v1154_v3  ;;  %1194 = vmatpush3.bf16.msra.mxu1 %v1154_v3  ;;  %v218_v14 = vld [vmem:[%s1723_s1 + $0x40] sm:$0xff]  ;;  %v221_v18 = vld [vmem:[%s1723_s1 + $0x58] sm:$0xff]  ;;  %v223_v21 = vld [vmem:[%s1723_s1 + $0x68] sm:$0xff] }
   0x6   :  { %1159 = vmatprep.subr.bf16.mxu0 %v1158_v5  ;;  %1187 = vmatprep.subr.bf16.mxu1 %v1158_v5  ;;  %v1170_v16 = vpack.c.bf16 %v219_v15, %v218_v14  ;;  %v1174_v19 = vpack.c.bf16 %v221_v18, %v220_v17  ;;  %v222_v20 = vld [vmem:[%s1723_s1 + $0x60] sm:$0xff]  ;;  %v224_v23 = vld [vmem:[%s1723_s1 + $0x70] sm:$0xff]  ;;  %v225_v24 = vld [vmem:[%s1723_s1 + $0x78] sm:$0xff] }
   0x7   :  { %1058 = vmatprep.mubr.f32.mxu0 %v146_v9  ;;  %1106 = vmatprep.mubr.f32.mxu1 %v178_v10  ;;  %v1178_v22 = vpack.c.bf16 %v223_v21, %v222_v20  ;;  %v1182_v25 = vpack.c.bf16 %v225_v24, %v224_v23  ;;  %v147_v26 = vld [vmem:[%s1724_s0 + $0x8] sm:$0xff]  ;;  %v148_v28 = vld [vmem:[%s1724_s0 + $0x10] sm:$0xff]  ;;  %v149_v30 = vld [vmem:[%s1724_s0 + $0x18] sm:$0xff] }
   0x8   :  { %v179_v27 = vld [vmem:[%s1724_s0 + $0x108] sm:$0xff]  ;;  %v180_v29 = vld [vmem:[%s1724_s0 + $0x110] sm:$0xff]  ;;  %v181_v31 = vld [vmem:[%s1724_s0 + $0x118] sm:$0xff] }
   0x9   :  { %1161 = vmatpush3.bf16.msra.mxu0 %v1158_v5  ;;  %1195 = vmatpush3.bf16.msra.mxu1 %v1158_v5  ;;  %v150_v32 = vld [vmem:[%s1724_s0 + $0x20] sm:$0xff]  ;;  %v151_v34 = vld [vmem:[%s1724_s0 + $0x28] sm:$0xff]  ;;  %v152_v36 = vld [vmem:[%s1724_s0 + $0x30] sm:$0xff] }
   0xa   :  { %1163 = vmatprep.subr.bf16.mxu0 %v1162_v8  ;;  %1188 = vmatprep.subr.bf16.mxu1 %v1162_v8  ;;  %v182_v33 = vld [vmem:[%s1724_s0 + $0x120] sm:$0xff]  ;;  %v183_v35 = vld [vmem:[%s1724_s0 + $0x128] sm:$0xff]  ;;  %v184_v37 = vld [vmem:[%s1724_s0 + $0x130] sm:$0xff] }
   0xb   :  { %v153_v38 = vld [vmem:[%s1724_s0 + $0x38] sm:$0xff]  ;;  %v154_v40 = vld [vmem:[%s1724_s0 + $0x40] sm:$0xff]  ;;  %v155_v42 = vld [vmem:[%s1724_s0 + $0x48] sm:$0xff] }
   0xc   :  { %v185_v39 = vld [vmem:[%s1724_s0 + $0x138] sm:$0xff]  ;;  %v186_v41 = vld [vmem:[%s1724_s0 + $0x140] sm:$0xff]  ;;  %v187_v43 = vld [vmem:[%s1724_s0 + $0x148] sm:$0xff] }
   0xd   :  { %1165 = vmatpush3.bf16.msra.mxu0 %v1162_v8  ;;  %1196 = vmatpush3.bf16.msra.mxu1 %v1162_v8  ;;  %v156_v44 = vld [vmem:[%s1724_s0 + $0x50] sm:$0xff]  ;;  %v157_v46 = vld [vmem:[%s1724_s0 + $0x58] sm:$0xff]  ;;  %v158_v48 = vld [vmem:[%s1724_s0 + $0x60] sm:$0xff] }
   0xe   :  { %1167 = vmatprep.subr.bf16.mxu0 %v1166_v13  ;;  %1189 = vmatprep.subr.bf16.mxu1 %v1166_v13  ;;  %v188_v45 = vld [vmem:[%s1724_s0 + $0x150] sm:$0xff]  ;;  %v189_v47 = vld [vmem:[%s1724_s0 + $0x158] sm:$0xff]  ;;  %v190_v49 = vld [vmem:[%s1724_s0 + $0x160] sm:$0xff] }
   0xf   :  { %v159_v50 = vld [vmem:[%s1724_s0 + $0x68] sm:$0xff]  ;;  %v160_v52 = vld [vmem:[%s1724_s0 + $0x70] sm:$0xff]  ;;  %v161_v54 = vld [vmem:[%s1724_s0 + $0x78] sm:$0xff] }
  0x10   :  { %v191_v51 = vld [vmem:[%s1724_s0 + $0x168] sm:$0xff]  ;;  %v192_v53 = vld [vmem:[%s1724_s0 + $0x170] sm:$0xff]  ;;  %v193_v55 = vld [vmem:[%s1724_s0 + $0x178] sm:$0xff] }
  0x11   :  { %1169 = vmatpush3.bf16.msra.mxu0 %v1166_v13  ;;  %1197 = vmatpush3.bf16.msra.mxu1 %v1166_v13  ;;  %v162_v56 = vld [vmem:[%s1724_s0 + $0x80] sm:$0xff]  ;;  %v163_v58 = vld [vmem:[%s1724_s0 + $0x88] sm:$0xff]  ;;  %v164_v60 = vld [vmem:[%s1724_s0 + $0x90] sm:$0xff] }
  0x12   :  { %1171 = vmatprep.subr.bf16.mxu0 %v1170_v16  ;;  %1190 = vmatprep.subr.bf16.mxu1 %v1170_v16  ;;  %v194_v57 = vld [vmem:[%s1724_s0 + $0x180] sm:$0xff]  ;;  %v195_v59 = vld [vmem:[%s1724_s0 + $0x188] sm:$0xff]  ;;  %v196_v61 = vld [vmem:[%s1724_s0 + $0x190] sm:$0xff] }
  0x13   :  { %v165_v62 = vld [vmem:[%s1724_s0 + $0x98] sm:$0xff]  ;;  %v166_v0 = vld [vmem:[%s1724_s0 + $0xa0] sm:$0xff]  ;;  %v167_v2 = vld [vmem:[%s1724_s0 + $0xa8] sm:$0xff] }
  0x14   :  { %v197_v63 = vld [vmem:[%s1724_s0 + $0x198] sm:$0xff]  ;;  %v198_v1 = vld [vmem:[%s1724_s0 + $0x1a0] sm:$0xff]  ;;  %v199_v3 = vld [vmem:[%s1724_s0 + $0x1a8] sm:$0xff] }
  0x15   :  { %1173 = vmatpush3.bf16.msra.mxu0 %v1170_v16  ;;  %1198 = vmatpush3.bf16.msra.mxu1 %v1170_v16  ;;  %v168_v4 = vld [vmem:[%s1724_s0 + $0xb0] sm:$0xff]  ;;  %v169_v6 = vld [vmem:[%s1724_s0 + $0xb8] sm:$0xff]  ;;  %v170_v8 = vld [vmem:[%s1724_s0 + $0xc0] sm:$0xff] }
  0x16   :  { %1175 = vmatprep.subr.bf16.mxu0 %v1174_v19  ;;  %1191 = vmatprep.subr.bf16.mxu1 %v1174_v19  ;;  %v200_v5 = vld [vmem:[%s1724_s0 + $0x1b0] sm:$0xff]  ;;  %v201_v7 = vld [vmem:[%s1724_s0 + $0x1b8] sm:$0xff]  ;;  %v202_v9 = vld [vmem:[%s1724_s0 + $0x1c0] sm:$0xff] }
  0x17   :  { %v171_v10 = vld [vmem:[%s1724_s0 + $0xc8] sm:$0xff]  ;;  %v172_v12 = vld [vmem:[%s1724_s0 + $0xd0] sm:$0xff]  ;;  %v173_v14 = vld [vmem:[%s1724_s0 + $0xd8] sm:$0xff] }
  0x18   :  { %v203_v11 = vld [vmem:[%s1724_s0 + $0x1c8] sm:$0xff]  ;;  %v204_v13 = vld [vmem:[%s1724_s0 + $0x1d0] sm:$0xff]  ;;  %v205_v15 = vld [vmem:[%s1724_s0 + $0x1d8] sm:$0xff] }
  0x19   :  { %1177 = vmatpush3.bf16.msra.mxu0 %v1174_v19  ;;  %1199 = vmatpush3.bf16.msra.mxu1 %v1174_v19  ;;  %v174_v16 = vld [vmem:[%s1724_s0 + $0xe0] sm:$0xff]  ;;  %v175_v18 = vld [vmem:[%s1724_s0 + $0xe8] sm:$0xff]  ;;  %v176_v20 = vld [vmem:[%s1724_s0 + $0xf0] sm:$0xff] }
  0x1a   :  { %1179 = vmatprep.subr.bf16.mxu0 %v1178_v22  ;;  %1192 = vmatprep.subr.bf16.mxu1 %v1178_v22  ;;  %v206_v17 = vld [vmem:[%s1724_s0 + $0x1e0] sm:$0xff]  ;;  %v207_v19 = vld [vmem:[%s1724_s0 + $0x1e8] sm:$0xff]  ;;  %v208_v21 = vld [vmem:[%s1724_s0 + $0x1f0] sm:$0xff] }
  0x1b   :  { %v209_v23 = vld [vmem:[%s1724_s0 + $0x1f8] sm:$0xff]  ;;  %v1465_v24 = vld [vmem:[%s1725_s2] ss:$0 sm:$0xff] }
  0x1d   :  { %1181 = vmatpush3.bf16.msra.mxu0 %v1178_v22  ;;  %1200 = vmatpush3.bf16.msra.mxu1 %v1178_v22  ;;  %v177_v22 = vld [vmem:[%s1724_s0 + $0xf8] sm:$0xff] }
  0x1e   :  { %1183 = vmatprep.subr.bf16.mxu0 %v1182_v25  ;;  %1193 = vmatprep.subr.bf16.mxu1 %v1182_v25 }
  0x21   :  { %1185 = vmatpush3.bf16.msra.mxu0 %v1182_v25  ;;  %1201 = vmatpush3.bf16.msra.mxu1 %v1182_v25 }
  0x24   :  { %1059 = vmatmul.mubr.f32.vlgmr.msra.gmra.mrb[0].mxu0 %v147_v26  ;;  %1107 = vmatmul.mubr.f32.vlgmr.msra.gmra.mrb[0].mxu1 %v179_v27 }
  0x25   :  { %1061 = vmatprep.mubr.f32.mxu0 %v148_v28  ;;  %1109 = vmatprep.mubr.f32.mxu1 %v180_v29 }
  0x28   :  { %1062 = vmatmul.mubr.f32.gmra.mrb[2].mxu0 %v149_v30  ;;  %1110 = vmatmul.mubr.f32.gmra.mrb[2].mxu1 %v181_v31 }
  0x29   :  { %1064 = vmatprep.mubr.f32.mxu0 %v150_v32  ;;  %1112 = vmatprep.mubr.f32.mxu1 %v182_v33 }
  0x2c   :  { %1065 = vmatmul.mubr.f32.gmra.mrb[4].mxu0 %v151_v34  ;;  %1113 = vmatmul.mubr.f32.gmra.mrb[4].mxu1 %v183_v35 }
  0x2d   :  { %1067 = vmatprep.mubr.f32.mxu0 %v152_v36  ;;  %1115 = vmatprep.mubr.f32.mxu1 %v184_v37 }
  0x30   :  { %1068 = vmatmul.mubr.f32.gmra.mrb[6].mxu0 %v153_v38  ;;  %1116 = vmatmul.mubr.f32.gmra.mrb[6].mxu1 %v185_v39 }
  0x31   :  { %1070 = vmatprep.mubr.f32.mxu0 %v154_v40  ;;  %1118 = vmatprep.mubr.f32.mxu1 %v186_v41 }
  0x34   :  { %1071 = vmatmul.mubr.f32.gmra.mrb[8].mxu0 %v155_v42  ;;  %1119 = vmatmul.mubr.f32.gmra.mrb[8].mxu1 %v187_v43 }
  0x35   :  { %1073 = vmatprep.mubr.f32.mxu0 %v156_v44  ;;  %1121 = vmatprep.mubr.f32.mxu1 %v188_v45 }
  0x38   :  { %1074 = vmatmul.mubr.f32.gmra.mrb[10].mxu0 %v157_v46  ;;  %1122 = vmatmul.mubr.f32.gmra.mrb[10].mxu1 %v189_v47 }
  0x39   :  { %1076 = vmatprep.mubr.f32.mxu0 %v158_v48  ;;  %1124 = vmatprep.mubr.f32.mxu1 %v190_v49 }
  0x3c   :  { %1077 = vmatmul.mubr.f32.gmra.mrb[12].mxu0 %v159_v50  ;;  %1125 = vmatmul.mubr.f32.gmra.mrb[12].mxu1 %v191_v51 }
  0x3d   :  { %1079 = vmatprep.mubr.f32.mxu0 %v160_v52  ;;  %1127 = vmatprep.mubr.f32.mxu1 %v192_v53 }
  0x40   :  { %1080 = vmatmul.mubr.f32.gmra.mrb[14].mxu0 %v161_v54  ;;  %1128 = vmatmul.mubr.f32.gmra.mrb[14].mxu1 %v193_v55 }
  0x41   :  { %1082 = vmatprep.mubr.f32.mxu0 %v162_v56  ;;  %1130 = vmatprep.mubr.f32.mxu1 %v194_v57 }
  0x44   :  { %1083 = vmatmul.mubr.f32.gmra.mrb[16].mxu0 %v163_v58  ;;  %1131 = vmatmul.mubr.f32.gmra.mrb[16].mxu1 %v195_v59 }
  0x45   :  { %1085 = vmatprep.mubr.f32.mxu0 %v164_v60  ;;  %1133 = vmatprep.mubr.f32.mxu1 %v196_v61 }
  0x48   :  { %1086 = vmatmul.mubr.f32.gmra.mrb[18].mxu0 %v165_v62  ;;  %1134 = vmatmul.mubr.f32.gmra.mrb[18].mxu1 %v197_v63 }
  0x49   :  { %1088 = vmatprep.mubr.f32.mxu0 %v166_v0  ;;  %1136 = vmatprep.mubr.f32.mxu1 %v198_v1 }
  0x4c   :  { %1089 = vmatmul.mubr.f32.gmra.mrb[20].mxu0 %v167_v2  ;;  %1137 = vmatmul.mubr.f32.gmra.mrb[20].mxu1 %v199_v3 }
  0x4d   :  { %1091 = vmatprep.mubr.f32.mxu0 %v168_v4  ;;  %1139 = vmatprep.mubr.f32.mxu1 %v200_v5 }
  0x50   :  { %1092 = vmatmul.mubr.f32.gmra.mrb[22].mxu0 %v169_v6  ;;  %1140 = vmatmul.mubr.f32.gmra.mrb[22].mxu1 %v201_v7 }
  0x51   :  { %1094 = vmatprep.mubr.f32.mxu0 %v170_v8  ;;  %1142 = vmatprep.mubr.f32.mxu1 %v202_v9 }
  0x54   :  { %1095 = vmatmul.mubr.f32.gmra.mrb[24].mxu0 %v171_v10  ;;  %1143 = vmatmul.mubr.f32.gmra.mrb[24].mxu1 %v203_v11 }
  0x55   :  { %1097 = vmatprep.mubr.f32.mxu0 %v172_v12  ;;  %1145 = vmatprep.mubr.f32.mxu1 %v204_v13 }
  0x58   :  { %1098 = vmatmul.mubr.f32.gmra.mrb[26].mxu0 %v173_v14  ;;  %1146 = vmatmul.mubr.f32.gmra.mrb[26].mxu1 %v205_v15 }
  0x59   :  { %1100 = vmatprep.mubr.f32.mxu0 %v174_v16  ;;  %1148 = vmatprep.mubr.f32.mxu1 %v206_v17 }
  0x5c   :  { %1101 = vmatmul.mubr.f32.gmra.mrb[28].mxu0 %v175_v18  ;;  %1149 = vmatmul.mubr.f32.gmra.mrb[28].mxu1 %v207_v19 }
  0x5d   :  { %1103 = vmatprep.mubr.f32.mxu0 %v176_v20  ;;  %1151 = vmatprep.mubr.f32.mxu1 %v208_v21 }
  0x60   :  { %1104 = vmatmul.mubr.f32.gmra.mrb[30].mxu0 %v177_v22  ;;  %1152 = vmatmul.mubr.f32.gmra.mrb[30].mxu1 %v209_v23 }
  0xf7   :  { %v1060_v25 = vpop.f32.mrb[0].mxu0  ;;  %v1108_v26 = vpop.f32.mrb[0].mxu1 }
  0xf8   :  { %v814_v27 = vadd.f32 %v1060_v25, %v1465_v24  ;;  %v846_v28 = vadd.f32 %v1108_v26, %v1465_v24  ;;  %v292_v29 = vpop.f32.mrb[1].mxu0  ;;  %v452_v30 = vpop.f32.mrb[1].mxu1 }
  0xf9   :  { %v813_v31 = vadd.f32 %v1465_v24, %v292_v29  ;;  %v845_v32 = vadd.f32 %v1465_v24, %v452_v30 }
  0xfa   :  { %878 = vst [vmem:[%s1726_s3 + $0x8] sm:$0xff] %v814_v27  ;;  %910 = vst [vmem:[%s1726_s3 + $0x108] sm:$0xff] %v846_v28 }
  0xfb   :  { %877 = vst [vmem:[%s1726_s3] sm:$0xff] %v813_v31  ;;  %909 = vst [vmem:[%s1726_s3 + $0x100] sm:$0xff] %v845_v32  ;;  %v1063_v33 = vpop.f32.mrb[2].mxu0  ;;  %v1111_v34 = vpop.f32.mrb[2].mxu1 }
  0xfc   :  { %v816_v35 = vadd.f32 %v1063_v33, %v1465_v24  ;;  %v848_v36 = vadd.f32 %v1111_v34, %v1465_v24  ;;  %v302_v37 = vpop.f32.mrb[3].mxu0  ;;  %v462_v38 = vpop.f32.mrb[3].mxu1 }
  0xfd   :  { %v815_v39 = vadd.f32 %v1465_v24, %v302_v37  ;;  %v847_v40 = vadd.f32 %v1465_v24, %v462_v38 }
  0xfe   :  { %880 = vst [vmem:[%s1726_s3 + $0x18] sm:$0xff] %v816_v35  ;;  %912 = vst [vmem:[%s1726_s3 + $0x118] sm:$0xff] %v848_v36 }
  0xff   :  { %879 = vst [vmem:[%s1726_s3 + $0x10] sm:$0xff] %v815_v39  ;;  %911 = vst [vmem:[%s1726_s3 + $0x110] sm:$0xff] %v847_v40  ;;  %v1066_v41 = vpop.f32.mrb[4].mxu0  ;;  %v1114_v42 = vpop.f32.mrb[4].mxu1 }
 0x100   :  { %v818_v43 = vadd.f32 %v1066_v41, %v1465_v24  ;;  %v850_v44 = vadd.f32 %v1114_v42, %v1465_v24  ;;  %v312_v45 = vpop.f32.mrb[5].mxu0  ;;  %v472_v46 = vpop.f32.mrb[5].mxu1 }
 0x101   :  { %v817_v47 = vadd.f32 %v1465_v24, %v312_v45  ;;  %v849_v48 = vadd.f32 %v1465_v24, %v472_v46 }
 0x102   :  { %882 = vst [vmem:[%s1726_s3 + $0x28] sm:$0xff] %v818_v43  ;;  %914 = vst [vmem:[%s1726_s3 + $0x128] sm:$0xff] %v850_v44 }
 0x103   :  { %881 = vst [vmem:[%s1726_s3 + $0x20] sm:$0xff] %v817_v47  ;;  %913 = vst [vmem:[%s1726_s3 + $0x120] sm:$0xff] %v849_v48  ;;  %v1069_v49 = vpop.f32.mrb[6].mxu0  ;;  %v1117_v50 = vpop.f32.mrb[6].mxu1 }
 0x104   :  { %v820_v51 = vadd.f32 %v1069_v49, %v1465_v24  ;;  %v852_v52 = vadd.f32 %v1117_v50, %v1465_v24  ;;  %v322_v53 = vpop.f32.mrb[7].mxu0  ;;  %v482_v54 = vpop.f32.mrb[7].mxu1 }
 0x105   :  { %v819_v55 = vadd.f32 %v1465_v24, %v322_v53  ;;  %v851_v56 = vadd.f32 %v1465_v24, %v482_v54 }
 0x106   :  { %884 = vst [vmem:[%s1726_s3 + $0x38] sm:$0xff] %v820_v51  ;;  %916 = vst [vmem:[%s1726_s3 + $0x138] sm:$0xff] %v852_v52 }
 0x107   :  { %883 = vst [vmem:[%s1726_s3 + $0x30] sm:$0xff] %v819_v55  ;;  %915 = vst [vmem:[%s1726_s3 + $0x130] sm:$0xff] %v851_v56  ;;  %v1072_v57 = vpop.f32.mrb[8].mxu0  ;;  %v1120_v58 = vpop.f32.mrb[8].mxu1 }
 0x108   :  { %v822_v59 = vadd.f32 %v1072_v57, %v1465_v24  ;;  %v854_v60 = vadd.f32 %v1120_v58, %v1465_v24  ;;  %v332_v61 = vpop.f32.mrb[9].mxu0  ;;  %v492_v62 = vpop.f32.mrb[9].mxu1 }
 0x109   :  { %v821_v63 = vadd.f32 %v1465_v24, %v332_v61  ;;  %v853_v0 = vadd.f32 %v1465_v24, %v492_v62 }
 0x10a   :  { %886 = vst [vmem:[%s1726_s3 + $0x48] sm:$0xff] %v822_v59  ;;  %918 = vst [vmem:[%s1726_s3 + $0x148] sm:$0xff] %v854_v60 }
 0x10b   :  { %885 = vst [vmem:[%s1726_s3 + $0x40] sm:$0xff] %v821_v63  ;;  %917 = vst [vmem:[%s1726_s3 + $0x140] sm:$0xff] %v853_v0  ;;  %v1075_v1 = vpop.f32.mrb[10].mxu0  ;;  %v1123_v2 = vpop.f32.mrb[10].mxu1 }
 0x10c   :  { %v824_v3 = vadd.f32 %v1075_v1, %v1465_v24  ;;  %v856_v4 = vadd.f32 %v1123_v2, %v1465_v24  ;;  %v342_v5 = vpop.f32.mrb[11].mxu0  ;;  %v502_v6 = vpop.f32.mrb[11].mxu1 }
 0x10d   :  { %v823_v7 = vadd.f32 %v1465_v24, %v342_v5  ;;  %v855_v8 = vadd.f32 %v1465_v24, %v502_v6 }
 0x10e   :  { %888 = vst [vmem:[%s1726_s3 + $0x58] sm:$0xff] %v824_v3  ;;  %920 = vst [vmem:[%s1726_s3 + $0x158] sm:$0xff] %v856_v4 }
 0x10f   :  { %887 = vst [vmem:[%s1726_s3 + $0x50] sm:$0xff] %v823_v7  ;;  %919 = vst [vmem:[%s1726_s3 + $0x150] sm:$0xff] %v855_v8  ;;  %v1078_v9 = vpop.f32.mrb[12].mxu0  ;;  %v1126_v10 = vpop.f32.mrb[12].mxu1 }
 0x110   :  { %v826_v11 = vadd.f32 %v1078_v9, %v1465_v24  ;;  %v858_v12 = vadd.f32 %v1126_v10, %v1465_v24  ;;  %v352_v13 = vpop.f32.mrb[13].mxu0  ;;  %v512_v14 = vpop.f32.mrb[13].mxu1 }
 0x111   :  { %v825_v15 = vadd.f32 %v1465_v24, %v352_v13  ;;  %v857_v16 = vadd.f32 %v1465_v24, %v512_v14 }
 0x112   :  { %890 = vst [vmem:[%s1726_s3 + $0x68] sm:$0xff] %v826_v11  ;;  %922 = vst [vmem:[%s1726_s3 + $0x168] sm:$0xff] %v858_v12 }
 0x113   :  { %889 = vst [vmem:[%s1726_s3 + $0x60] sm:$0xff] %v825_v15  ;;  %921 = vst [vmem:[%s1726_s3 + $0x160] sm:$0xff] %v857_v16  ;;  %v1081_v17 = vpop.f32.mrb[14].mxu0  ;;  %v1129_v18 = vpop.f32.mrb[14].mxu1 }
 0x114   :  { %v828_v19 = vadd.f32 %v1081_v17, %v1465_v24  ;;  %v860_v20 = vadd.f32 %v1129_v18, %v1465_v24  ;;  %v362_v21 = vpop.f32.mrb[15].mxu0  ;;  %v522_v22 = vpop.f32.mrb[15].mxu1 }
 0x115   :  { %v827_v23 = vadd.f32 %v1465_v24, %v362_v21  ;;  %v859_v25 = vadd.f32 %v1465_v24, %v522_v22 }
 0x116   :  { %892 = vst [vmem:[%s1726_s3 + $0x78] sm:$0xff] %v828_v19  ;;  %924 = vst [vmem:[%s1726_s3 + $0x178] sm:$0xff] %v860_v20 }
 0x117   :  { %891 = vst [vmem:[%s1726_s3 + $0x70] sm:$0xff] %v827_v23  ;;  %923 = vst [vmem:[%s1726_s3 + $0x170] sm:$0xff] %v859_v25  ;;  %v1084_v26 = vpop.f32.mrb[16].mxu0  ;;  %v1132_v27 = vpop.f32.mrb[16].mxu1 }
 0x118   :  { %v830_v28 = vadd.f32 %v1084_v26, %v1465_v24  ;;  %v862_v29 = vadd.f32 %v1132_v27, %v1465_v24  ;;  %v372_v30 = vpop.f32.mrb[17].mxu0  ;;  %v532_v31 = vpop.f32.mrb[17].mxu1 }
 0x119   :  { %v829_v32 = vadd.f32 %v1465_v24, %v372_v30  ;;  %v861_v33 = vadd.f32 %v1465_v24, %v532_v31 }
 0x11a   :  { %894 = vst [vmem:[%s1726_s3 + $0x88] sm:$0xff] %v830_v28  ;;  %926 = vst [vmem:[%s1726_s3 + $0x188] sm:$0xff] %v862_v29 }
 0x11b   :  { %893 = vst [vmem:[%s1726_s3 + $0x80] sm:$0xff] %v829_v32  ;;  %925 = vst [vmem:[%s1726_s3 + $0x180] sm:$0xff] %v861_v33  ;;  %v1087_v34 = vpop.f32.mrb[18].mxu0  ;;  %v1135_v35 = vpop.f32.mrb[18].mxu1 }
 0x11c   :  { %v832_v36 = vadd.f32 %v1087_v34, %v1465_v24  ;;  %v864_v37 = vadd.f32 %v1135_v35, %v1465_v24  ;;  %v382_v38 = vpop.f32.mrb[19].mxu0  ;;  %v542_v39 = vpop.f32.mrb[19].mxu1 }
 0x11d   :  { %v831_v40 = vadd.f32 %v1465_v24, %v382_v38  ;;  %v863_v41 = vadd.f32 %v1465_v24, %v542_v39 }
 0x11e   :  { %896 = vst [vmem:[%s1726_s3 + $0x98] sm:$0xff] %v832_v36  ;;  %928 = vst [vmem:[%s1726_s3 + $0x198] sm:$0xff] %v864_v37 }
 0x11f   :  { %895 = vst [vmem:[%s1726_s3 + $0x90] sm:$0xff] %v831_v40  ;;  %927 = vst [vmem:[%s1726_s3 + $0x190] sm:$0xff] %v863_v41  ;;  %v1090_v42 = vpop.f32.mrb[20].mxu0  ;;  %v1138_v43 = vpop.f32.mrb[20].mxu1 }
 0x120   :  { %v834_v44 = vadd.f32 %v1090_v42, %v1465_v24  ;;  %v866_v45 = vadd.f32 %v1138_v43, %v1465_v24  ;;  %v392_v46 = vpop.f32.mrb[21].mxu0  ;;  %v552_v47 = vpop.f32.mrb[21].mxu1 }
 0x121   :  { %v833_v48 = vadd.f32 %v1465_v24, %v392_v46  ;;  %v865_v49 = vadd.f32 %v1465_v24, %v552_v47 }
 0x122   :  { %898 = vst [vmem:[%s1726_s3 + $0xa8] sm:$0xff] %v834_v44  ;;  %930 = vst [vmem:[%s1726_s3 + $0x1a8] sm:$0xff] %v866_v45 }
 0x123   :  { %897 = vst [vmem:[%s1726_s3 + $0xa0] sm:$0xff] %v833_v48  ;;  %929 = vst [vmem:[%s1726_s3 + $0x1a0] sm:$0xff] %v865_v49  ;;  %v1093_v50 = vpop.f32.mrb[22].mxu0  ;;  %v1141_v51 = vpop.f32.mrb[22].mxu1 }
 0x124   :  { %v836_v52 = vadd.f32 %v1093_v50, %v1465_v24  ;;  %v868_v53 = vadd.f32 %v1141_v51, %v1465_v24  ;;  %v402_v54 = vpop.f32.mrb[23].mxu0  ;;  %v562_v55 = vpop.f32.mrb[23].mxu1 }
 0x125   :  { %v835_v56 = vadd.f32 %v1465_v24, %v402_v54  ;;  %v867_v57 = vadd.f32 %v1465_v24, %v562_v55 }
 0x126   :  { %900 = vst [vmem:[%s1726_s3 + $0xb8] sm:$0xff] %v836_v52  ;;  %932 = vst [vmem:[%s1726_s3 + $0x1b8] sm:$0xff] %v868_v53 }
 0x127   :  { %899 = vst [vmem:[%s1726_s3 + $0xb0] sm:$0xff] %v835_v56  ;;  %931 = vst [vmem:[%s1726_s3 + $0x1b0] sm:$0xff] %v867_v57  ;;  %v1096_v58 = vpop.f32.mrb[24].mxu0  ;;  %v1144_v59 = vpop.f32.mrb[24].mxu1 }
 0x128   :  { %v838_v60 = vadd.f32 %v1096_v58, %v1465_v24  ;;  %v870_v61 = vadd.f32 %v1144_v59, %v1465_v24  ;;  %v412_v62 = vpop.f32.mrb[25].mxu0  ;;  %v572_v63 = vpop.f32.mrb[25].mxu1 }
 0x129   :  { %v837_v0 = vadd.f32 %v1465_v24, %v412_v62  ;;  %v869_v1 = vadd.f32 %v1465_v24, %v572_v63 }
 0x12a   :  { %902 = vst [vmem:[%s1726_s3 + $0xc8] sm:$0xff] %v838_v60  ;;  %934 = vst [vmem:[%s1726_s3 + $0x1c8] sm:$0xff] %v870_v61 }
 0x12b   :  { %901 = vst [vmem:[%s1726_s3 + $0xc0] sm:$0xff] %v837_v0  ;;  %933 = vst [vmem:[%s1726_s3 + $0x1c0] sm:$0xff] %v869_v1  ;;  %v1099_v2 = vpop.f32.mrb[26].mxu0  ;;  %v1147_v3 = vpop.f32.mrb[26].mxu1 }
 0x12c   :  { %v840_v4 = vadd.f32 %v1099_v2, %v1465_v24  ;;  %v872_v5 = vadd.f32 %v1147_v3, %v1465_v24  ;;  %v422_v6 = vpop.f32.mrb[27].mxu0  ;;  %v582_v7 = vpop.f32.mrb[27].mxu1 }
 0x12d   :  { %v839_v8 = vadd.f32 %v1465_v24, %v422_v6  ;;  %v871_v9 = vadd.f32 %v1465_v24, %v582_v7 }
 0x12e   :  { %904 = vst [vmem:[%s1726_s3 + $0xd8] sm:$0xff] %v840_v4  ;;  %936 = vst [vmem:[%s1726_s3 + $0x1d8] sm:$0xff] %v872_v5 }
 0x12f   :  { %903 = vst [vmem:[%s1726_s3 + $0xd0] sm:$0xff] %v839_v8  ;;  %935 = vst [vmem:[%s1726_s3 + $0x1d0] sm:$0xff] %v871_v9  ;;  %v1102_v10 = vpop.f32.mrb[28].mxu0  ;;  %v1150_v11 = vpop.f32.mrb[28].mxu1 }
 0x130   :  { %v842_v12 = vadd.f32 %v1102_v10, %v1465_v24  ;;  %v874_v13 = vadd.f32 %v1150_v11, %v1465_v24  ;;  %v432_v14 = vpop.f32.mrb[29].mxu0  ;;  %v592_v15 = vpop.f32.mrb[29].mxu1 }
 0x131   :  { %v841_v16 = vadd.f32 %v1465_v24, %v432_v14  ;;  %v873_v17 = vadd.f32 %v1465_v24, %v592_v15 }
 0x132   :  { %906 = vst [vmem:[%s1726_s3 + $0xe8] sm:$0xff] %v842_v12  ;;  %938 = vst [vmem:[%s1726_s3 + $0x1e8] sm:$0xff] %v874_v13 }
 0x133   :  { %905 = vst [vmem:[%s1726_s3 + $0xe0] sm:$0xff] %v841_v16  ;;  %937 = vst [vmem:[%s1726_s3 + $0x1e0] sm:$0xff] %v873_v17  ;;  %v1105_v18 = vpop.f32.mrb[30].mxu0  ;;  %v1153_v19 = vpop.f32.mrb[30].mxu1 }
 0x134   :  { %v844_v20 = vadd.f32 %v1105_v18, %v1465_v24  ;;  %v876_v21 = vadd.f32 %v1153_v19, %v1465_v24  ;;  %v442_v22 = vpop.f32.mrb[31].mxu0  ;;  %v602_v23 = vpop.f32.mrb[31].mxu1 }
 0x135   :  { %v843_v25 = vadd.f32 %v1465_v24, %v442_v22  ;;  %v875_v26 = vadd.f32 %v1465_v24, %v602_v23 }
 0x136   :  { %908 = vst [vmem:[%s1726_s3 + $0xf8] sm:$0xff] %v844_v20  ;;  %940 = vst [vmem:[%s1726_s3 + $0x1f8] sm:$0xff] %v876_v21 }
 0x137   :  { %907 = vst [vmem:[%s1726_s3 + $0xf0] sm:$0xff] %v843_v25  ;;  %939 = vst [vmem:[%s1726_s3 + $0x1f0] sm:$0xff] %v875_v26 }

</bundles_post_ra>
